<compile_context>
chip_gen: v6e
topology: v6e:2x2x1
jax: 0.10.0
libtpu: 0.0.40
codegen_flags: <defaults>
</compile_context>

<pallas_src>
import numpy as np
import jax
import jax.numpy as jnp
from jax.experimental import pallas as pl
from jax.experimental.pallas import tpu as pltpu

LANE = 128      # vreg lane width
SUBLANE = 8     # vreg sublane count (f32)


def h_swish_kernel(x_ref, o_ref):
    # h_swish(x) = x * h_sigmoid(x) = x * clip(x + 3, 0, 6) / 6
    x = x_ref[...].astype(jnp.float32)          # keep VPU math in f32 (v5e-safe)
    gate = jnp.clip(x + 3.0, 0.0, 6.0) * (1.0 / 6.0)
    o_ref[...] = (x * gate).astype(o_ref.dtype)


def h_swish(x, *, block_rows=1024):
    """Elementwise h_swish on an arbitrarily shaped array via one pallas_call.

    The array is flattened and viewed as a lane-dense (rows, 128) 2-D slab;
    the row axis is tiled across a 1-D 'parallel' grid.
    """
    orig_shape = x.shape
    orig_dtype = x.dtype
    n = int(np.prod(orig_shape)) if orig_shape else 1

    # Row count of the (rows, 128) view, rounded up to a sublane multiple.
    rows = -(-n // LANE)
    rows = -(-rows // SUBLANE) * SUBLANE
    # Pick a block size: as big as possible, multiple of 8, capped by block_rows.
    br = min(block_rows, rows)
    br = max(SUBLANE, (br // SUBLANE) * SUBLANE)
    rows_padded = -(-rows // br) * br
    total_padded = rows_padded * LANE

    flat = jnp.ravel(x)
    if total_padded != n:
        # Only hit when the element count is not already lane/tile aligned.
        flat = jnp.pad(flat, (0, total_padded - n))
    x2d = flat.reshape(rows_padded, LANE)       # contiguous reshape: no data movement

    grid = (rows_padded // br,)
    out2d = pl.pallas_call(
        h_swish_kernel,
        out_shape=jax.ShapeDtypeStruct((rows_padded, LANE), orig_dtype),
        grid=grid,
        in_specs=[pl.BlockSpec((br, LANE), lambda i: (i, 0))],
        out_specs=pl.BlockSpec((br, LANE), lambda i: (i, 0)),
        compiler_params=pltpu.CompilerParams(
            dimension_semantics=("parallel",)),
    )(x2d)

    out_flat = out2d.reshape(-1)
    if total_padded != n:
        out_flat = out_flat[:n]
    return out_flat.reshape(orig_shape)


def h_swish_ref(x):
    """Pure-JAX reference mirroring torch: x * relu6(x + 3) / 6."""
    xf = x.astype(jnp.float32)
    return (xf * jnp.clip(xf + 3.0, 0.0, 6.0) / 6.0).astype(x.dtype)


if __name__ == "__main__":
    key = jax.random.PRNGKey(0)
    # NCHW-style input consistent with the module's usage: batch=2, C=4, H=W=16.
    x = jax.random.normal(key, (2, 4, 16, 16), jnp.float32) * 4.0

    y = jax.block_until_ready(h_swish(x))
    y_ref = jax.block_until_ready(h_swish_ref(x))

    assert y.shape == x.shape and y.dtype == x.dtype
    np.testing.assert_allclose(np.asarray(y), np.asarray(y_ref),
                               atol=1e-6, rtol=1e-6)
    print("KERNEL_OK")
</pallas_src>

<mosaic_0001>
module attributes {stable_mosaic.version = 11 : i64} {
  func.func @h_swish_kernel(%arg0: i32, %arg1: memref<16x128xf32, #tpu.memory_space<vmem>>, %arg2: memref<16x128xf32, #tpu.memory_space<vmem>>) attributes {dimension_semantics = [#tpu.dimension_semantics<parallel>], iteration_bounds = array<i64: 1>, scalar_prefetch = 0 : i64, scratch_operands = 0 : i64, tpu.core_type = #tpu.core_type<tc>, window_params = [{transform_indices = @transform_0, window_bounds = array<i64: 16, 128>}, {transform_indices = @transform_1, window_bounds = array<i64: 16, 128>}]} {
    %c0 = arith.constant 0 : index
    %c0_0 = arith.constant 0 : index
    %0 = vector.load %arg1[%c0, %c0_0] : memref<16x128xf32, #tpu.memory_space<vmem>>, vector<16x128xf32>
    %cst = arith.constant 3.000000e+00 : f32
    %1 = vector.broadcast %cst : f32 to vector<16x128xf32>
    %2 = arith.addf %0, %1 : vector<16x128xf32>
    %cst_1 = arith.constant 0.000000e+00 : f32
    %cst_2 = arith.constant 6.000000e+00 : f32
    %3 = vector.broadcast %cst_1 : f32 to vector<16x128xf32>
    %4 = arith.maximumf %3, %2 : vector<16x128xf32>
    %5 = vector.broadcast %cst_2 : f32 to vector<16x128xf32>
    %6 = arith.minimumf %5, %4 : vector<16x128xf32>
    %cst_3 = arith.constant 0.166666672 : f32
    %7 = vector.broadcast %cst_3 : f32 to vector<16x128xf32>
    %8 = arith.mulf %6, %7 : vector<16x128xf32>
    %9 = arith.mulf %0, %8 : vector<16x128xf32>
    %c0_4 = arith.constant 0 : index
    %c0_5 = arith.constant 0 : index
    %10 = vector.load %arg2[%c0_4, %c0_5] : memref<16x128xf32, #tpu.memory_space<vmem>>, vector<16x128xf32>
    tpu.vector_store %arg2[%c0_4, %c0_5], %9 {strides = array<i32>} : memref<16x128xf32, #tpu.memory_space<vmem>>, vector<16x128xf32>,
    return
  }
  func.func @transform_0(%arg0: i32) -> (i32, i32) {
    %c0_i32 = arith.constant 0 : i32
    %c0_i32_0 = arith.constant 0 : i32
    return %arg0, %c0_i32 : i32, i32
  }
  func.func @transform_1(%arg0: i32) -> (i32, i32) {
    %c0_i32 = arith.constant 0 : i32
    %c0_i32_0 = arith.constant 0 : i32
    return %arg0, %c0_i32 : i32, i32
  }
}

</mosaic_0001>

<bundles_post_ra>
// kernel: tpu_custom_call.1
= control target key start
LH: loop header
LB: loop body
LE: loop exit
PB: predicated region body
PF: predicated region fallthrough
CT: control target
= control target key end

     0   :  { %6 = vsyncpa [#allocation3], 0  ;;  %s128_s0 = inlined_call_operand.hbm [shape: f32[16,128], index: 0, kind: input, shape index: {}]   ;;  %s129_s1 = inlined_call_operand.hbm [shape: f32[16,128], index: 1, kind: output, shape index: {}]  }
   0x1   :  { %7 = vsyncpa [#allocation4], 0  ;;  %s102_s6 = smov [#allocation2]  }
   0x2   :  { %s13_s7 = sshll.u32 %s102_s6, 4  ;;  %s14_s7 = int_to_ptr.vmem [resolvable:$true] %s13_s7 }
   0x3   :  { %s66_s8 = scalar_lea.vmem %s14_s7, 256  ;;  %p71_p1 = scmp.lt.s32.totalorder %s14_s7, %s14_s7 }
   0x4   :  { %p67_p0 = scmp.ne.s32.totalorder %s14_s7, %s66_s8  ;;  %p72_p2 = scmp.lt.s32.totalorder %s66_s8, %s66_s8 }
   0x6   :  { %p73_p3 = por %p72_p2, %p71_p1 }
   0x8   :  { %p74_p4 = pnand %p73_p3, %p67_p0 }
   0xa   :  { %77 = shalt.err (!%p74_p4)
}
   0xb   :  { %s103_s9 = smov 128   ;;  %s104_s10 = smov 8  }
   0xc   :  { %19 = dma.hbm_to_vmem [thread:$0]  %s128_s0, 256, %s14_s7, [#allocation3], %s103_s9, %s103_s9, %s104_s10  }
   0xd   :  { %98 = dma.done.wait [#allocation3], 256  }
   0xe   :  { %99 = vsyncadd [#allocation3], 4294967040  ;;  %v23_v0 = vld [vmem:[#allocation2] sm:$0xff]  ;;  %v24_v1 = vld [vmem:[#allocation2 + $0x8] sm:$0xff]  ;;  %s105_s13 = smov [#allocation5]  }
   0xf   :  { %v25_v2 = vadd.f32 3.0, %v23_v0  ;;  %v26_v3 = vadd.f32 3.0, %v24_v1  ;;  %s42_s14 = sshll.u32 %s105_s13, 4  ;;  %s43_s14 = int_to_ptr.vmem [resolvable:$true] %s42_s14 }
  0x10   :  { %s78_s0 = scalar_lea.vmem %s43_s14, 256  ;;  %p83_p6 = scmp.lt.s32.totalorder %s43_s14, %s43_s14 }
  0x11   :  { %v27_v4 = vmax.f32 %v25_v2, 0.0  ;;  %v28_v5 = vmax.f32 %v26_v3, 0.0  ;;  %p79_p5 = scmp.ne.s32.totalorder %s43_s14, %s78_s0  ;;  %p84_p7 = scmp.lt.s32.totalorder %s78_s0, %s78_s0 }
  0x13   :  { %v29_v6 = vmin.f32 %v27_v4, 6.0  ;;  %v30_v7 = vmin.f32 %v28_v5, 6.0  ;;  %p85_p8 = por %p84_p7, %p83_p6 }
  0x15   :  { %v31_v8 = vmul.f32 0.16666667, %v29_v6  ;;  %v32_v9 = vmul.f32 0.16666667, %v30_v7  ;;  %p86_p9 = pnand %p85_p8, %p79_p5 }
  0x17   :  { %v33_v10 = vmul.f32 %v31_v8, %v23_v0  ;;  %v34_v11 = vmul.f32 %v32_v9, %v24_v1 }
  0x19   :  { %35 = vst [vmem:[#allocation5] sm:$0xff] %v33_v10  ;;  %36 = vst [vmem:[#allocation5 + $0x8] sm:$0xff] %v34_v11 }
  0x1a   :  { %89 = shalt.err (!%p86_p9)
}
  0x1b   :  { %48 = dma.vmem_to_hbm [thread:$0]  %s43_s14, 256, %s129_s1, [#allocation4], %s103_s9, %s103_s9, %s104_s10  }
  0x1c   :  { %100 = dma.done.wait [#allocation4], 256  }
  0x1d   :  { %101 = vsyncadd [#allocation4], 4294967040 }
  0x1e   :  { %52 = vsyncpa [#allocation3], 1 }
  0x1f   :  { %53 = vsyncpa [#allocation4], 1 }

</bundles_post_ra>
